<compile_context>
chip_gen: v5e
topology: v5e:2x2
jax: 0.10.0
libtpu: 0.0.40
codegen_flags: <defaults>
</compile_context>

<pallas_src>
import jax
import jax.numpy as jnp
from jax import lax
from jax.experimental import pallas as pl
from jax.experimental.pallas import tpu as pltpu


def _make_classifier_kernel(batch, tile_b):
    """Kernel closure over the true batch size and the batch tile size."""
    inv_b = 1.0 / float(batch)

    def kernel(x_ref, w1_ref, b1_ref, w2_ref, b2_ref, tgt_ref, loss_ref, acc_ref):
        i = pl.program_id(0)

        @pl.when(i == 0)
        def _():
            acc_ref[...] = jnp.zeros_like(acc_ref)

        # ----- encoder: Linear + ReLU (MXU matmul, f32 accumulation) -----
        h = jnp.dot(x_ref[...], w1_ref[...], preferred_element_type=jnp.float32)
        h = jnp.maximum(h + b1_ref[...], 0.0)                       # (TB, H)

        # ----- discriminator: Linear(H, 1) -----
        # 1-wide MXU matmul replaced by VPU mul + lane (XLU) reduction.
        logits = jnp.sum(h * w2_ref[...], axis=-1, keepdims=True) + b2_ref[...]  # (TB, 1)

        # ----- sigmoid + BCE fused in logits space -----
        #   log(sigmoid(z))     = -softplus(-z)
        #   log(1 - sigmoid(z)) = -softplus(z)
        # Stable softplus: max(z, 0) + log(1 + exp(-|z|)); clamp at -100 like torch.
        sp_pos = jnp.maximum(logits, 0.0) + jnp.log(1.0 + jnp.exp(-jnp.abs(logits)))
        sp_neg = sp_pos - logits                                    # softplus(-z)
        log_p = jnp.maximum(-sp_neg, -100.0)
        log_1mp = jnp.maximum(-sp_pos, -100.0)

        t = tgt_ref[...]                                            # (TB, 1) float
        bce = -(t * log_p + (1.0 - t) * log_1mp)                    # (TB, 1)

        # Mask out padded tail rows so they don't contribute to the mean.
        row = i * tile_b + lax.broadcasted_iota(jnp.int32, bce.shape, 0)
        bce = jnp.where(row < batch, bce, 0.0)

        # Running sum (pure vector path, (1,1) accumulator).
        acc_ref[...] += jnp.sum(bce, axis=0, keepdims=True)

        @pl.when(i == pl.num_programs(0) - 1)
        def _():
            loss_ref[...] = acc_ref[...] * inv_b                    # mean over true B

    return kernel


def classifier_forward(x, w1, b1, w2, b2, tgt, *, tile_b=128):
    """x: [B, D_in] f32, tgt: [B] {0,1} -> scalar BCE loss (f32)."""
    B, d_in = x.shape
    H = w1.shape[1]

    n_tiles = pl.cdiv(B, tile_b)
    b_pad = n_tiles * tile_b

    # Pad the batch to a multiple of the tile (padded rows are masked in-kernel).
    x_p = x if b_pad == B else jnp.pad(x, ((0, b_pad - B), (0, 0)))
    tgt_f = tgt.astype(jnp.float32).reshape(B, 1)                   # tgt.float().view(-1)
    tgt_p = tgt_f if b_pad == B else jnp.pad(tgt_f, ((0, b_pad - B), (0, 0)))

    w2_row = w2.reshape(1, H)     # (H,1) -> (1,H) row for the VPU/lane reduction
    b1_row = b1.reshape(1, H)
    b2_11 = b2.reshape(1, 1)

    kernel = _make_classifier_kernel(B, tile_b)
    pinned = lambda shape: pl.BlockSpec(shape, lambda i: (0,) * len(shape))

    loss = pl.pallas_call(
        kernel,
        out_shape=jax.ShapeDtypeStruct((1, 1), jnp.float32),
        grid=(n_tiles,),
        in_specs=[
            pl.BlockSpec((tile_b, d_in), lambda i: (i, 0)),         # x: streamed
            pinned((d_in, H)),                                      # w1: VMEM-resident
            pinned((1, H)),                                         # b1
            pinned((1, H)),                                         # w2 (row)
            pinned((1, 1)),                                         # b2
            pl.BlockSpec((tile_b, 1), lambda i: (i, 0)),            # tgt: streamed
        ],
        out_specs=pl.BlockSpec((1, 1), lambda i: (0, 0)),
        scratch_shapes=[pltpu.VMEM((1, 1), jnp.float32)],           # loss accumulator
        compiler_params=pltpu.CompilerParams(
            dimension_semantics=("arbitrary",)),                    # reduction axis
    )(x_p, w1, b1_row, w2_row, b2_11, tgt_p)

    return loss[0, 0]


def _xavier(key, shape):
    fan_in, fan_out = shape
    bound = (6.0 / (fan_in + fan_out)) ** 0.5
    return jax.random.uniform(key, shape, jnp.float32, -bound, bound)


if __name__ == "__main__":
    # Small but lane-aligned demo sizes: 2 batch tiles exercise the accumulator.
    B, D_IN, H = 256, 128, 128

    key = jax.random.PRNGKey(0)
    kx, kt, kw1, kb1, kw2, kb2 = jax.random.split(key, 6)

    # Deterministic synthetic inputs / parameters (no checkpoint loading).
    x = jax.random.normal(kx, (B, D_IN), jnp.float32)
    tgt = jax.random.bernoulli(kt, 0.5, (B,)).astype(jnp.int32)

    w1 = _xavier(kw1, (D_IN, H))
    b1 = jax.random.uniform(kb1, (H,), jnp.float32, -0.1, 0.1)
    w2 = _xavier(kw2, (H, 1))
    b2 = jax.random.uniform(kb2, (1,), jnp.float32, -0.1, 0.1)

    loss = classifier_forward(x, w1, b1, w2, b2, tgt)
    jax.block_until_ready(loss)

    # Pure-JAX reference of the PyTorch math (sigmoid -> BCE with -100 clamp).
    h_ref = jnp.maximum(x @ w1 + b1, 0.0)
    p_ref = jax.nn.sigmoid(h_ref @ w2 + b2).reshape(-1)
    t_ref = tgt.astype(jnp.float32).reshape(-1)
    bce_ref = -(t_ref * jnp.maximum(jnp.log(p_ref), -100.0)
                + (1.0 - t_ref) * jnp.maximum(jnp.log(1.0 - p_ref), -100.0))
    ref = jnp.mean(bce_ref)
    assert jnp.allclose(loss, ref, rtol=1e-5, atol=1e-5), (loss, ref)

    print("KERNEL_OK")
</pallas_src>

<mosaic_0001>
module attributes {stable_mosaic.version = 11 : i64} {
  func.func @kernel(%arg0: i32, %arg1: memref<128x128xf32, #tpu.memory_space<vmem>>, %arg2: memref<128x128xf32, #tpu.memory_space<vmem>>, %arg3: memref<1x128xf32, #tpu.memory_space<vmem>>, %arg4: memref<1x128xf32, #tpu.memory_space<vmem>>, %arg5: memref<1x1xf32, #tpu.memory_space<vmem>>, %arg6: memref<128x1xf32, #tpu.memory_space<vmem>>, %arg7: memref<1x1xf32, #tpu.memory_space<vmem>>, %arg8: memref<1x1xf32, #tpu.memory_space<vmem>>) attributes {dimension_semantics = [#tpu.dimension_semantics<arbitrary>], iteration_bounds = array<i64: 2>, scalar_prefetch = 0 : i64, scratch_operands = 1 : i64, tpu.core_type = #tpu.core_type<tc>, window_params = [{transform_indices = @transform_0, window_bounds = array<i64: 128, 128>}, {pipeline_mode = #tpu.pipeline_mode<synchronous>, transform_indices = @transform_1, window_bounds = array<i64: 128, 128>}, {pipeline_mode = #tpu.pipeline_mode<synchronous>, transform_indices = @transform_2, window_bounds = array<i64: 1, 128>}, {pipeline_mode = #tpu.pipeline_mode<synchronous>, transform_indices = @transform_3, window_bounds = array<i64: 1, 128>}, {pipeline_mode = #tpu.pipeline_mode<synchronous>, transform_indices = @transform_4, window_bounds = array<i64: 1, 1>}, {transform_indices = @transform_5, window_bounds = array<i64: 128, 1>}, {pipeline_mode = #tpu.pipeline_mode<synchronous>, transform_indices = @transform_6, window_bounds = array<i64: 1, 1>}]} {
    %c0_i32 = arith.constant 0 : i32
    %0 = arith.cmpi eq, %arg0, %c0_i32 : i32
    %1 = arith.extui %0 : i1 to i32
    %c0_i32_0 = arith.constant 0 : i32
    %2 = arith.cmpi ne, %1, %c0_i32_0 : i32
    scf.if %2 {
      %cst_30 = arith.constant 0.000000e+00 : f32
      %62 = vector.broadcast %cst_30 : f32 to vector<1x1xf32>
      %c0_31 = arith.constant 0 : index
      %c0_32 = arith.constant 0 : index
      %63 = vector.load %arg8[%c0_31, %c0_32] : memref<1x1xf32, #tpu.memory_space<vmem>>, vector<1x1xf32>
      tpu.vector_store %arg8[%c0_31, %c0_32], %62 {strides = array<i32>} : memref<1x1xf32, #tpu.memory_space<vmem>>, vector<1x1xf32>,
    } else {
    }
    %c0 = arith.constant 0 : index
    %c0_1 = arith.constant 0 : index
    %3 = vector.load %arg1[%c0, %c0_1] : memref<128x128xf32, #tpu.memory_space<vmem>>, vector<128x128xf32>
    %c0_2 = arith.constant 0 : index
    %c0_3 = arith.constant 0 : index
    %4 = vector.load %arg2[%c0_2, %c0_3] : memref<128x128xf32, #tpu.memory_space<vmem>>, vector<128x128xf32>
    %cst = arith.constant dense<0.000000e+00> : vector<128x128xf32>
    %5 = tpu.matmul %3, %4, %cst {dimension_numbers = #tpu.dot_dimension_numbers<[1], [0], [0], [1], [0, 0, 1, 1], [], []>} : vector<128x128xf32>, vector<128x128xf32>, vector<128x128xf32> -> vector<128x128xf32>
    %c0_4 = arith.constant 0 : index
    %c0_5 = arith.constant 0 : index
    %6 = vector.load %arg3[%c0_4, %c0_5] : memref<1x128xf32, #tpu.memory_space<vmem>>, vector<1x128xf32>
    %7 = vector.broadcast %6 : vector<1x128xf32> to vector<128x128xf32>
    %8 = arith.addf %5, %7 : vector<128x128xf32>
    %cst_6 = arith.constant 0.000000e+00 : f32
    %9 = vector.broadcast %cst_6 : f32 to vector<128x128xf32>
    %10 = arith.maximumf %8, %9 : vector<128x128xf32>
    %c0_7 = arith.constant 0 : index
    %c0_8 = arith.constant 0 : index
    %11 = vector.load %arg4[%c0_7, %c0_8] : memref<1x128xf32, #tpu.memory_space<vmem>>, vector<1x128xf32>
    %12 = vector.broadcast %11 : vector<1x128xf32> to vector<128x128xf32>
    %13 = arith.mulf %10, %12 : vector<128x128xf32>
    %cst_9 = arith.constant dense<0.000000e+00> : vector<128xf32>
    %14 = vector.multi_reduction <add>, %13, %cst_9 [1] : vector<128x128xf32> to vector<128xf32>
    %15 = vector.shape_cast %14 : vector<128xf32> to vector<128x1xf32>
    %c0_10 = arith.constant 0 : index
    %c0_11 = arith.constant 0 : index
    %16 = vector.load %arg5[%c0_10, %c0_11] : memref<1x1xf32, #tpu.memory_space<vmem>>, vector<1x1xf32>
    %17 = vector.broadcast %16 : vector<1x1xf32> to vector<128x1xf32>
    %18 = arith.addf %15, %17 : vector<128x1xf32>
    %cst_12 = arith.constant 0.000000e+00 : f32
    %19 = vector.broadcast %cst_12 : f32 to vector<128x1xf32>
    %20 = arith.maximumf %18, %19 : vector<128x1xf32>
    %21 = math.absf %18 : vector<128x1xf32>
    %cst_13 = arith.constant 0.000000e+00 : f32
    %22 = vector.broadcast %cst_13 : f32 to vector<128x1xf32>
    %23 = arith.subf %22, %21 : vector<128x1xf32>
    %24 = math.exp %23 : vector<128x1xf32>
    %cst_14 = arith.constant 1.000000e+00 : f32
    %25 = vector.broadcast %cst_14 : f32 to vector<128x1xf32>
    %26 = arith.addf %25, %24 : vector<128x1xf32>
    %27 = math.log %26 : vector<128x1xf32>
    %28 = arith.addf %20, %27 : vector<128x1xf32>
    %29 = arith.subf %28, %18 : vector<128x1xf32>
    %cst_15 = arith.constant 0.000000e+00 : f32
    %30 = vector.broadcast %cst_15 : f32 to vector<128x1xf32>
    %31 = arith.subf %30, %29 : vector<128x1xf32>
    %cst_16 = arith.constant -1.000000e+02 : f32
    %32 = vector.broadcast %cst_16 : f32 to vector<128x1xf32>
    %33 = arith.maximumf %31, %32 : vector<128x1xf32>
    %cst_17 = arith.constant 0.000000e+00 : f32
    %34 = vector.broadcast %cst_17 : f32 to vector<128x1xf32>
    %35 = arith.subf %34, %28 : vector<128x1xf32>
    %cst_18 = arith.constant -1.000000e+02 : f32
    %36 = vector.broadcast %cst_18 : f32 to vector<128x1xf32>
    %37 = arith.maximumf %35, %36 : vector<128x1xf32>
    %c0_19 = arith.constant 0 : index
    %c0_20 = arith.constant 0 : index
    %38 = vector.load %arg6[%c0_19, %c0_20] : memref<128x1xf32, #tpu.memory_space<vmem>>, vector<128x1xf32>
    %39 = arith.mulf %38, %33 : vector<128x1xf32>
    %cst_21 = arith.constant 1.000000e+00 : f32
    %40 = vector.broadcast %cst_21 : f32 to vector<128x1xf32>
    %41 = arith.subf %40, %38 : vector<128x1xf32>
    %42 = arith.mulf %41, %37 : vector<128x1xf32>
    %43 = arith.addf %39, %42 : vector<128x1xf32>
    %cst_22 = arith.constant 0.000000e+00 : f32
    %44 = vector.broadcast %cst_22 : f32 to vector<128x1xf32>
    %45 = arith.subf %44, %43 : vector<128x1xf32>
    %c128_i32 = arith.constant 128 : i32
    %46 = arith.muli %arg0, %c128_i32 : i32
    %47 = tpu.iota {dimensions = array<i32: 0>} : vector<128x1xi32>
    %48 = vector.broadcast %46 : i32 to vector<128x1xi32>
    %49 = arith.addi %48, %47 : vector<128x1xi32>
    %c256_i32 = arith.constant 256 : i32
    %50 = vector.broadcast %c256_i32 : i32 to vector<128x1xi32>
    %51 = arith.cmpi slt, %49, %50 : vector<128x1xi32>
    %cst_23 = arith.constant 0.000000e+00 : f32
    %52 = vector.broadcast %cst_23 : f32 to vector<128x1xf32>
    %53 = arith.select %51, %45, %52 : vector<128x1xi1>, vector<128x1xf32>
    %c0_24 = arith.constant 0 : index
    %c0_25 = arith.constant 0 : index
    %54 = vector.load %arg8[%c0_24, %c0_25] : memref<1x1xf32, #tpu.memory_space<vmem>>, vector<1x1xf32>
    %cst_26 = arith.constant dense<0.000000e+00> : vector<1xf32>
    %55 = vector.multi_reduction <add>, %53, %cst_26 [0] : vector<128x1xf32> to vector<1xf32>
    %56 = vector.shape_cast %55 : vector<1xf32> to vector<1x1xf32>
    %57 = arith.addf %54, %56 : vector<1x1xf32>
    %c0_27 = arith.constant 0 : index
    %c0_28 = arith.constant 0 : index
    %58 = vector.load %arg8[%c0_27, %c0_28] : memref<1x1xf32, #tpu.memory_space<vmem>>, vector<1x1xf32>
    tpu.vector_store %arg8[%c0_27, %c0_28], %57 {strides = array<i32>} : memref<1x1xf32, #tpu.memory_space<vmem>>, vector<1x1xf32>,
    %c1_i32 = arith.constant 1 : i32
    %59 = arith.cmpi eq, %arg0, %c1_i32 : i32
    %60 = arith.extui %59 : i1 to i32
    %c0_i32_29 = arith.constant 0 : i32
    %61 = arith.cmpi ne, %60, %c0_i32_29 : i32
    scf.if %61 {
      %c0_30 = arith.constant 0 : index
      %c0_31 = arith.constant 0 : index
      %62 = vector.load %arg8[%c0_30, %c0_31] : memref<1x1xf32, #tpu.memory_space<vmem>>, vector<1x1xf32>
      %cst_32 = arith.constant 3.906250e-03 : f32
      %63 = vector.broadcast %cst_32 : f32 to vector<1x1xf32>
      %64 = arith.mulf %62, %63 : vector<1x1xf32>
      %c0_33 = arith.constant 0 : index
      %c0_34 = arith.constant 0 : index
      %65 = vector.load %arg7[%c0_33, %c0_34] : memref<1x1xf32, #tpu.memory_space<vmem>>, vector<1x1xf32>
      tpu.vector_store %arg7[%c0_33, %c0_34], %64 {strides = array<i32>} : memref<1x1xf32, #tpu.memory_space<vmem>>, vector<1x1xf32>,
    } else {
    }
    return
  }
  func.func @transform_0(%arg0: i32) -> (i32, i32) {
    %c0_i32 = arith.constant 0 : i32
    %c0_i32_0 = arith.constant 0 : i32
    return %arg0, %c0_i32 : i32, i32
  }
  func.func @transform_1(%arg0: i32) -> (i32, i32) {
    %c0_i32 = arith.constant 0 : i32
    %c0_i32_0 = arith.constant 0 : i32
    %c0_i32_1 = arith.constant 0 : i32
    return %c0_i32, %c0_i32_0 : i32, i32
  }
  func.func @transform_2(%arg0: i32) -> (i32, i32) {
    %c0_i32 = arith.constant 0 : i32
    %c0_i32_0 = arith.constant 0 : i32
    %c0_i32_1 = arith.constant 0 : i32
    return %c0_i32, %c0_i32_0 : i32, i32
  }
  func.func @transform_3(%arg0: i32) -> (i32, i32) {
    %c0_i32 = arith.constant 0 : i32
    %c0_i32_0 = arith.constant 0 : i32
    %c0_i32_1 = arith.constant 0 : i32
    return %c0_i32, %c0_i32_0 : i32, i32
  }
  func.func @transform_4(%arg0: i32) -> (i32, i32) {
    %c0_i32 = arith.constant 0 : i32
    %c0_i32_0 = arith.constant 0 : i32
    %c0_i32_1 = arith.constant 0 : i32
    return %c0_i32, %c0_i32_0 : i32, i32
  }
  func.func @transform_5(%arg0: i32) -> (i32, i32) {
    %c0_i32 = arith.constant 0 : i32
    %c0_i32_0 = arith.constant 0 : i32
    return %arg0, %c0_i32 : i32, i32
  }
  func.func @transform_6(%arg0: i32) -> (i32, i32) {
    %c0_i32 = arith.constant 0 : i32
    %c0_i32_0 = arith.constant 0 : i32
    %c0_i32_1 = arith.constant 0 : i32
    return %c0_i32, %c0_i32_0 : i32, i32
  }
}

</mosaic_0001>

<bundles_post_ra>
// kernel: tpu_custom_call.1
= control target key start
LH: loop header
LB: loop body
LE: loop exit
PB: predicated region body
PF: predicated region fallthrough
CT: control target
= control target key end

     0   :  { %s1655_s0 = inlined_call_operand.vmem [shape: f32[256,128], index: 0, kind: input, shape index: {}]   ;;  %s1656_s1 = inlined_call_operand.hbm [shape: f32[128,128], index: 1, kind: input, shape index: {}]   ;;  %s1657_s2 = inlined_call_operand.vmem [shape: f32[1,128], index: 2, kind: input, shape index: {}]   ;;  %s1658_s3 = inlined_call_operand.vmem [shape: f32[1,128], index: 3, kind: input, shape index: {}]   ;;  %s1659_s4 = inlined_call_operand.<no memory space> [shape: f32[1,1], index: 4, kind: input, shape index: {}]   ;;  %s1660_s5 = inlined_call_operand.vmem [shape: f32[256,1], index: 5, kind: input, shape index: {}]   ;;  %s1661_s6 = inlined_call_operand.hbm [shape: f32[1,1], index: 6, kind: output, shape index: {}]  }
   0x1   :  { %v11_v0 = vstv %s1659_s4 }
   0x2   :  { %12 = vst [vmem:[#allocation3] sm:$0x1] %v11_v0 }
   0x3   :  { %13 = vsyncpa [#allocation5], 0 }
   0x4   :  { %14 = vsyncpa [#allocation6], 0  ;;  %s1262_s23 = smov 0  }
   0x5 LB: > { %s193_s26 = sshll.u32 %s1656_s1, 4  ;;  %s1271_s27 = sadd.s32 4294967295, %s1217_s23   ;;  %s1217_s23 = sphi %s1262_s23, %s20_s23   ;;  %s194_s26 = int_to_ptr.hbm [resolvable:$true] %s193_s26 }
   0x6   : > { %p985_p0 = scmp.ge.s32.totalorder %s1217_s23, 1  ;;  %p182_p1 = scmp.lt.s32.totalorder %s1217_s23, 3 }
   0x7   : > { %p986_p2 = scmp.ne.s32.totalorder %s1271_s27, 0  ;;  %p1061_p3 = scmp.eq.s32.totalorder %s1271_s27, 0 }
   0x8   : > { %p183_p4 = pnand %p985_p0, %p182_p1  ;;  %s1219_s4 = smov [#allocation4]  }
   0x9   : > { %s195_s28 = sshll.u32 %s1219_s4, 4  ;;  %s1220_s29 = smov 128   ;;  %s196_s28 = int_to_ptr.vmem [resolvable:$true] %s195_s28 }
   0xa   : > { %p1057_p5 = pneg %p183_p4  ;;  %s1221_s30 = smov 8  }
   0xb   : > { %238 = sbr.rel (%p183_p4) target bundleno = 458 (0x1ca), region = 44 }
   0xc   : > { %p1058_p6 = pnand %p1061_p3, %p1057_p5 }
   0xe   : > { %1060 = dma.hbm_to_vmem [thread:$0]  (!%p1058_p6), %s194_s26, 2048, %s196_s28, [#allocation5], %s1220_s29, %s1220_s29, %s1221_s30  }
  0x10   : > { %1208 = dma.done.wait (%p1061_p3), [#allocation5], 2048  }
  0x11   : > { %1210 = vsyncadd (%p1061_p3), [#allocation5], 4294965248  ;;  %s990_s7 = sshll.u32 %s1271_s27, 4 }
  0x12   : > { %p270_p7 = scmp.lt.s32.totalorder %s990_s7, 31  ;;  %284 = sbr.rel (%p986_p2) target bundleno = 25 (0x19), region = 52 }
  0x14   : > { %s1663_s7 = smov (!%p270_p7, %s990_s7), 31 }
  0x15   : > { %s991_s8 = sshll.u32 %s1663_s7, 3 }
  0x16   : > { %s1281_s11 = scalar_lea.vmem %s1655_s0, %s991_s8  ;;  %s1286_s14 = scalar_lea.vmem %s1660_s5, %s991_s8 }
  0x17   : > { %vm285_vm0 = vcmask 0   ;;  %v1222_v1 = vmov 0.0  }
  0x18   : > { %286 = vst.msk [vmem:[#allocation2] sm:$0x1] %vm285_vm0, %v1222_v1 }
  0x19 PF: > { %v318_v2 = vld [vmem:[#allocation4 + $0x78] sm:$0xff]  ;;  %v317_v3 = vld [vmem:[#allocation4 + $0x70] sm:$0xff]  ;;  %v316_v4 = vld [vmem:[#allocation4 + $0x68] sm:$0xff]  ;;  %s995_s19 = sshll.u32 %s1271_s27, 7  ;;  %vm864_vm4 = vcmask 7168   ;;  %p996_p8 = scmp.ne.s32.totalorder %s1271_s27, 1 }
  0x1a   : > { %323 = vmatpush.msra.mxu0 %v318_v2  ;;  %1001 = vmatpush.msra.mxu1 %v318_v2  ;;  %v315_v5 = vld [vmem:[#allocation4 + $0x60] sm:$0xff]  ;;  %v314_v6 = vld [vmem:[#allocation4 + $0x58] sm:$0xff]  ;;  %v313_v7 = vld [vmem:[#allocation4 + $0x50] sm:$0xff] }
  0x1b   : > { %1002 = vmatpush.msra.mxu2 %v318_v2  ;;  %1003 = vmatpush.msra.mxu3 %v318_v2  ;;  %v312_v8 = vld [vmem:[#allocation4 + $0x48] sm:$0xff]  ;;  %v311_v9 = vld [vmem:[#allocation4 + $0x40] sm:$0xff]  ;;  %v310_v10 = vld [vmem:[#allocation4 + $0x38] sm:$0xff] }
  0x1c   : > { %324 = vmatpush.msra.mxu0 %v317_v3  ;;  %1004 = vmatpush.msra.mxu1 %v317_v3  ;;  %v309_v11 = vld [vmem:[#allocation4 + $0x30] sm:$0xff]  ;;  %v308_v12 = vld [vmem:[#allocation4 + $0x28] sm:$0xff]  ;;  %v307_v13 = vld [vmem:[#allocation4 + $0x20] sm:$0xff] }
  0x1d   : > { %1005 = vmatpush.msra.mxu2 %v317_v3  ;;  %1006 = vmatpush.msra.mxu3 %v317_v3  ;;  %v306_v14 = vld [vmem:[#allocation4 + $0x18] sm:$0xff]  ;;  %v305_v15 = vld [vmem:[#allocation4 + $0x10] sm:$0xff]  ;;  %v304_v16 = vld [vmem:[#allocation4 + $0x8] sm:$0xff] }
  0x1e   : > { %325 = vmatpush.msra.mxu0 %v316_v4  ;;  %1007 = vmatpush.msra.mxu1 %v316_v4  ;;  %v303_v17 = vld [vmem:[#allocation4] sm:$0xff]  ;;  %v289_v26 = vld [vmem:[%s1281_s11 + $0x10] sm:$0xff]  ;;  %v290_v30 = vld [vmem:[%s1281_s11 + $0x18] sm:$0xff] }
  0x1f   : > { %1008 = vmatpush.msra.mxu2 %v316_v4  ;;  %1009 = vmatpush.msra.mxu3 %v316_v4  ;;  %v287_v18 = vld [vmem:[%s1281_s11] sm:$0xff]  ;;  %v288_v22 = vld [vmem:[%s1281_s11 + $0x8] sm:$0xff]  ;;  %v293_v27 = vld [vmem:[%s1281_s11 + $0x30] sm:$0xff] }
  0x20   : > { %326 = vmatpush.msra.mxu0 %v315_v5  ;;  %1010 = vmatpush.msra.mxu1 %v315_v5  ;;  %v291_v19 = vld [vmem:[%s1281_s11 + $0x20] sm:$0xff]  ;;  %v292_v23 = vld [vmem:[%s1281_s11 + $0x28] sm:$0xff]  ;;  %v297_v28 = vld [vmem:[%s1281_s11 + $0x50] sm:$0xff] }
  0x21   : > { %1011 = vmatpush.msra.mxu2 %v315_v5  ;;  %1012 = vmatpush.msra.mxu3 %v315_v5  ;;  %v295_v20 = vld [vmem:[%s1281_s11 + $0x40] sm:$0xff]  ;;  %v296_v24 = vld [vmem:[%s1281_s11 + $0x48] sm:$0xff]  ;;  %v301_v29 = vld [vmem:[%s1281_s11 + $0x70] sm:$0xff] }
  0x22   : > { %327 = vmatpush.msra.mxu0 %v314_v6  ;;  %1013 = vmatpush.msra.mxu1 %v314_v6  ;;  %v299_v21 = vld [vmem:[%s1281_s11 + $0x60] sm:$0xff]  ;;  %v300_v25 = vld [vmem:[%s1281_s11 + $0x68] sm:$0xff]  ;;  %v298_v31 = vld [vmem:[%s1281_s11 + $0x58] sm:$0xff] }
  0x23   : > { %1014 = vmatpush.msra.mxu2 %v314_v6  ;;  %1015 = vmatpush.msra.mxu3 %v314_v6  ;;  %v294_v32 = vld [vmem:[%s1281_s11 + $0x38] sm:$0xff]  ;;  %v1309_v34 = vld [vmem:[%s1657_s2] ss:$0 sm:$0xff] }
  0x24   : > { %328 = vmatpush.msra.mxu0 %v313_v7  ;;  %1016 = vmatpush.msra.mxu1 %v313_v7  ;;  %v302_v33 = vld [vmem:[%s1281_s11 + $0x78] sm:$0xff]  ;;  %v1315_v38 = vld [vmem:[%s1658_s3] ss:$0 sm:$0xff] }
  0x25   : > { %1017 = vmatpush.msra.mxu2 %v313_v7  ;;  %1018 = vmatpush.msra.mxu3 %v313_v7 }
  0x26   : > { %329 = vmatpush.msra.mxu0 %v312_v8  ;;  %1019 = vmatpush.msra.mxu1 %v312_v8 }
  0x27   : > { %1020 = vmatpush.msra.mxu2 %v312_v8  ;;  %1021 = vmatpush.msra.mxu3 %v312_v8 }
  0x28   : > { %330 = vmatpush.msra.mxu0 %v311_v9  ;;  %1022 = vmatpush.msra.mxu1 %v311_v9 }
  0x29   : > { %1023 = vmatpush.msra.mxu2 %v311_v9  ;;  %1024 = vmatpush.msra.mxu3 %v311_v9 }
  0x2a   : > { %331 = vmatpush.msra.mxu0 %v310_v10  ;;  %1025 = vmatpush.msra.mxu1 %v310_v10 }
  0x2b   : > { %1026 = vmatpush.msra.mxu2 %v310_v10  ;;  %1027 = vmatpush.msra.mxu3 %v310_v10 }
  0x2c   : > { %332 = vmatpush.msra.mxu0 %v309_v11  ;;  %1028 = vmatpush.msra.mxu1 %v309_v11 }
  0x2d   : > { %1029 = vmatpush.msra.mxu2 %v309_v11  ;;  %1030 = vmatpush.msra.mxu3 %v309_v11 }
  0x2e   : > { %333 = vmatpush.msra.mxu0 %v308_v12  ;;  %1031 = vmatpush.msra.mxu1 %v308_v12 }
  0x2f   : > { %1032 = vmatpush.msra.mxu2 %v308_v12  ;;  %1033 = vmatpush.msra.mxu3 %v308_v12 }
  0x30   : > { %334 = vmatpush.msra.mxu0 %v307_v13  ;;  %1034 = vmatpush.msra.mxu1 %v307_v13 }
  0x31   : > { %1035 = vmatpush.msra.mxu2 %v307_v13  ;;  %1036 = vmatpush.msra.mxu3 %v307_v13 }
  0x32   : > { %335 = vmatpush.msra.mxu0 %v306_v14  ;;  %1037 = vmatpush.msra.mxu1 %v306_v14 }
  0x33   : > { %1038 = vmatpush.msra.mxu2 %v306_v14  ;;  %1039 = vmatpush.msra.mxu3 %v306_v14 }
  0x34   : > { %336 = vmatpush.msra.mxu0 %v305_v15  ;;  %1040 = vmatpush.msra.mxu1 %v305_v15 }
  0x35   : > { %1041 = vmatpush.msra.mxu2 %v305_v15  ;;  %1042 = vmatpush.msra.mxu3 %v305_v15 }
  0x36   : > { %337 = vmatpush.msra.mxu0 %v304_v16  ;;  %1043 = vmatpush.msra.mxu1 %v304_v16 }
  0x37   : > { %1044 = vmatpush.msra.mxu2 %v304_v16  ;;  %1045 = vmatpush.msra.mxu3 %v304_v16 }
  0x38   : > { %338 = vmatpush.msra.mxu0 %v303_v17  ;;  %1046 = vmatpush.msra.mxu1 %v303_v17 }
  0x39   : > { %1047 = vmatpush.msra.mxu2 %v303_v17  ;;  %339 = vmatmul.f32.vlgmr.msra.gmra.mxu0 %v287_v18 }
  0x3a   : > { %351 = vmatmul.f32.vlgmr.msra.gmra.mxu1 %v291_v19  ;;  %363 = vmatmul.f32.vlgmr.msra.gmra.mxu2 %v295_v20 }
  0x3b   : > { %1048 = vmatpush.msra.mxu3 %v303_v17 }
  0x3c   : > { %375 = vmatmul.f32.vlgmr.msra.gmra.mxu3 %v299_v21 }
  0x41   : > { %342 = vmatmul.f32.gmra.mxu0 %v288_v22 }
  0x42   : > { %354 = vmatmul.f32.gmra.mxu1 %v292_v23  ;;  %366 = vmatmul.f32.gmra.mxu2 %v296_v24 }
  0x44   : > { %378 = vmatmul.f32.gmra.mxu3 %v300_v25 }
  0x49   : > { %345 = vmatmul.f32.gmra.mxu0 %v289_v26 }
  0x4a   : > { %357 = vmatmul.f32.gmra.mxu1 %v293_v27  ;;  %369 = vmatmul.f32.gmra.mxu2 %v297_v28 }
  0x4c   : > { %381 = vmatmul.f32.gmra.mxu3 %v301_v29 }
  0x51   : > { %348 = vmatmul.f32.gmra.mxu0 %v290_v30 }
  0x52   : > { %372 = vmatmul.f32.gmra.mxu2 %v298_v31  ;;  %360 = vmatmul.f32.gmra.mxu1 %v294_v32 }
  0x54   : > { %384 = vmatmul.f32.gmra.mxu3 %v302_v33 }
  0xb6   : > { %v340_v35 = vpop.f32.mrf.mxu0 }
  0xb7   : > { %v341_v36 = vadd.f32 %v1309_v34, %v340_v35  ;;  %v352_v37 = vpop.f32.mrf.mxu1 }
  0xb8   : > { %v353_v39 = vadd.f32 %v1309_v34, %v352_v37  ;;  %v1348_v37 = vld [vmem:[#allocation3] ss:$0 sm:$0xff] }
  0xb9   : > { %v388_v40 = vmax.f32 %v341_v36, 0.0 }
  0xba   : > { %v392_v41 = vmax.f32 %v353_v39, 0.0 }
  0xbb   : > { %v408_v42 = vmul.f32 %v1315_v38, %v388_v40 }
  0xbc   : > { %v412_v43 = vmul.f32 %v1315_v38, %v392_v41 }
  0xbd   : > { %v364_v44 = vpop.f32.mrf.mxu2  ;;  %424 = vadd.xlane.f32.xlu0 %v408_v42 }
  0xbe   : > { %432 = vadd.xlane.f32.xlu2 %v412_v43  ;;  %v343_v45 = vpop.f32.mrf.mxu0  ;;  %v365_v51 = vadd.f32 %v1309_v34, %v364_v44 }
  0xbf   : > { %v344_v46 = vadd.f32 %v1309_v34, %v343_v45  ;;  %v355_v47 = vpop.f32.mrf.mxu1  ;;  %v376_v48 = vpop.f32.mrf.mxu3 }
  0xc0   : > { %v356_v49 = vadd.f32 %v1309_v34, %v355_v47  ;;  %v396_v56 = vmax.f32 %v365_v51, 0.0  ;;  %v377_v14 = vadd.f32 %v1309_v34, %v376_v48 }
  0xc1   : > { %v389_v50 = vmax.f32 %v344_v46, 0.0 }
  0xc2   : > { %v393_v52 = vmax.f32 %v356_v49, 0.0  ;;  %v416_v1 = vmul.f32 %v1315_v38, %v396_v56  ;;  %v400_v19 = vmax.f32 %v377_v14, 0.0 }
  0xc3   : > { %v409_v53 = vmul.f32 %v1315_v38, %v389_v50 }
  0xc4   : > { %v413_v54 = vmul.f32 %v1315_v38, %v393_v52  ;;  %v420_v27 = vmul.f32 %v1315_v38, %v400_v19 }
  0xc5   : > { %v367_v55 = vpop.f32.mrf.mxu2  ;;  %426 = vadd.xlane.f32.xlu0 %v409_v53 }
  0xc6   : > { %434 = vadd.xlane.f32.xlu2 %v413_v54  ;;  %v346_v57 = vpop.f32.mrf.mxu0  ;;  %v368_v63 = vadd.f32 %v1309_v34, %v367_v55 }
  0xc7   : > { %v347_v58 = vadd.f32 %v1309_v34, %v346_v57  ;;  %v358_v59 = vpop.f32.mrf.mxu1  ;;  %v379_v60 = vpop.f32.mrf.mxu3 }
  0xc8   : > { %v359_v61 = vadd.f32 %v1309_v34, %v358_v59  ;;  %v397_v5 = vmax.f32 %v368_v63, 0.0  ;;  %v380_v32 = vadd.f32 %v1309_v34, %v379_v60 }
  0xc9   : > { %v390_v62 = vmax.f32 %v347_v58, 0.0 }
  0xca   : > { %v394_v0 = vmax.f32 %v359_v61, 0.0  ;;  %v417_v12 = vmul.f32 %v1315_v38, %v397_v5  ;;  %v401_v35 = vmax.f32 %v380_v32, 0.0 }
  0xcb   : > { %v410_v2 = vmul.f32 %v1315_v38, %v390_v62 }
  0xcc   : > { %v414_v3 = vmul.f32 %v1315_v38, %v394_v0  ;;  %v421_v36 = vmul.f32 %v1315_v38, %v401_v35 }
  0xcd   : > { %v370_v4 = vpop.f32.mrf.mxu2  ;;  %428 = vadd.xlane.f32.xlu1 %v410_v2 }
  0xce   : > { %440 = vadd.xlane.f32.xlu2 %v416_v1  ;;  %436 = vadd.xlane.f32.xlu0 %v414_v3  ;;  %v349_v6 = vpop.f32.mrf.mxu0  ;;  %v371_v25 = vadd.f32 %v1309_v34, %v370_v4 }
  0xcf   : > { %v350_v7 = vadd.f32 %v1309_v34, %v349_v6  ;;  %v361_v8 = vpop.f32.mrf.mxu1  ;;  %v382_v9 = vpop.f32.mrf.mxu3 }
  0xd0   : > { %v362_v11 = vadd.f32 %v1309_v34, %v361_v8  ;;  %v383_v21 = vadd.f32 %v1309_v34, %v382_v9  ;;  %v398_v29 = vmax.f32 %v371_v25, 0.0 }
  0xd1   : > { %v391_v10 = vmax.f32 %v350_v7, 0.0 }
  0xd2   : > { %v395_v16 = vmax.f32 %v362_v11, 0.0  ;;  %v402_v26 = vmax.f32 %v383_v21, 0.0  ;;  %v418_v33 = vmul.f32 %v1315_v38, %v398_v29 }
  0xd3   : > { %v411_v13 = vmul.f32 %v1315_v38, %v391_v10 }
  0xd4   : > { %v415_v22 = vmul.f32 %v1315_v38, %v395_v16  ;;  %v422_v30 = vmul.f32 %v1315_v38, %v402_v26 }
  0xd5   : > { %v373_v15 = vpop.f32.mrf.mxu2  ;;  %430 = vadd.xlane.f32.xlu1 %v411_v13  ;;  %v797_v13 = vlaneseq }
  0xd6   : > { %v374_v17 = vadd.f32 %v1309_v34, %v373_v15  ;;  %442 = vadd.xlane.f32.xlu0 %v417_v12 }
  0xd7   : > { %v385_v18 = vpop.f32.mrf.mxu3  ;;  %v1383_v21 = vshrl.u32 %v797_v13, 7 }
  0xd8   : > { %v399_v20 = vmax.f32 %v374_v17, 0.0  ;;  %v386_v24 = vadd.f32 %v1309_v34, %v385_v18 }
  0xda   : > { %v419_v23 = vmul.f32 %v1315_v38, %v399_v20  ;;  %v403_v28 = vmax.f32 %v386_v24, 0.0 }
  0xdc   : > { %446 = vadd.xlane.f32.xlu2 %v419_v23  ;;  %v423_v31 = vmul.f32 %v1315_v38, %v403_v28 }
  0xdd   : > { %438 = vadd.xlane.f32.xlu1 %v415_v22 }
  0xde   : > { %448 = vadd.xlane.f32.xlu0 %v420_v27 }
  0xe4   : > { %452 = vadd.xlane.f32.xlu2 %v422_v30  ;;  %v802_v30 = vadd.s32 32, %v1383_v21 }
  0xe5   : > { %444 = vadd.xlane.f32.xlu1 %v418_v33  ;;  %v1391_v33 = vld [vmem:[%s1286_s14 + $0x20] sm:$0xff] }
  0xe6   : > { %454 = vadd.xlane.f32.xlu0 %v423_v31  ;;  %v1388_v31 = vstv %s995_s19 }
  0xed   : > { %450 = vadd.xlane.f32.xlu1 %v421_v36 }
 0x130   : > { %v425_v39 = vpop.xlane.xlu0 %424 }
 0x131   : > { %v433_v40 = vpop.xlane.xlu2 %432  ;;  %v1351_v41 = vadd.f32 %v1348_v37, %v425_v39 }
 0x132   : > { %v1354_v42 = vadd.f32 %v1348_v37, %v433_v40 }
 0x133   : > { %v492_v34 = vand.u32 2147483647, %v1351_v41  ;;  %v476_v20 = vmax.f32 %v1351_v41, 0.0 }
 0x134   : > { %v496_v43 = vand.u32 2147483647, %v1354_v42  ;;  %v480_v28 = vmax.f32 %v1354_v42, 0.0 }
 0x135   : > { %v508_v44 = vsub.f32 0.0, %v492_v34  ;;  %v700_v34 = vld [vmem:[%s1286_s14] sm:$0xff] }
 0x136   : > { %v512_v45 = vsub.f32 0.0, %v496_v43  ;;  %v1396_v43 = vld [vmem:[%s1286_s14 + $0x28] sm:$0xff] }
 0x137   : > { %v524_v46 = vmul.f32 1.442695, %v508_v44  ;;  %v1399_v44 = vld [vmem:[%s1286_s14 + $0x8] sm:$0xff] }
 0x138   : > { %v427_v47 = vpop.xlane.xlu0 %426  ;;  %v532_v38 = vmul.f32 1.442695, %v512_v45 }
 0x139   : > { %1081 = vpow2.f32 %v524_v46  ;;  %v435_v48 = vpop.xlane.xlu2 %434  ;;  %v1359_v49 = vadd.f32 %v1348_v37, %v427_v47 }
 0x13a   : > { %v1362_v50 = vadd.f32 %v1348_v37, %v435_v48  ;;  %1083 = vpow2.f32 %v532_v38  ;;  %v736_v38 = vsub.f32 1.0, %v1391_v33  ;;  %v1404_v48 = vadd.s32 %v1388_v31, %v802_v30 }
 0x13b   : > { %v493_v51 = vand.u32 2147483647, %v1359_v49  ;;  %v477_v45 = vmax.f32 %v1359_v49, 0.0 }
 0x13c   : > { %v497_v52 = vand.u32 2147483647, %v1362_v50  ;;  %vm835_vm2 = vcmp.lt.s32.totalorder %v1404_v48, 256 }
 0x13d   : > { %v509_v53 = vsub.f32 0.0, %v493_v51  ;;  %v799_v51 = vadd.s32 8, %v1383_v21 }
 0x13e   : > { %v513_v55 = vsub.f32 0.0, %v497_v52 }
 0x13f   : > { %v1082_v54 = vpop.eup %1081  ;;  %v526_v56 = vmul.f32 1.442695, %v509_v53 }
 0x140   : > { %v429_v57 = vpop.xlane.xlu1 %428  ;;  %v556_v59 = vadd.f32 1.0, %v1082_v54  ;;  %v1084_v60 = vpop.eup %1083  ;;  %v534_v61 = vmul.f32 1.442695, %v513_v55 }
 0x141   : > { %1085 = vpow2.f32 %v526_v56  ;;  %v1367_v58 = vadd.f32 %v1348_v37, %v429_v57  ;;  %v441_v62 = vpop.xlane.xlu2 %440  ;;  %v560_v0 = vadd.f32 1.0, %v1084_v60  ;;  %v437_v4 = vpop.xlane.xlu0 %436  ;;  %v1412_v56 = vld [vmem:[%s1286_s14 + $0x40] sm:$0xff]  ;;  %v1416_v60 = vadd.s32 %v1388_v31, %v1383_v21 }
 0x142   : > { %1087 = vlog2.f32 %v556_v59  ;;  %v1371_v1 = vadd.f32 %v1348_v37, %v441_v62  ;;  %v1375_v8 = vadd.f32 %v1348_v37, %v437_v4  ;;  %v732_v59 = vsub.f32 1.0, %v700_v34 }
 0x143   : > { %v494_v63 = vand.u32 2147483647, %v1367_v58  ;;  %1089 = vpow2.f32 %v534_v61  ;;  %v737_v61 = vsub.f32 1.0, %v1396_v43  ;;  %v733_v62 = vsub.f32 1.0, %v1399_v44 }
 0x144   : > { %1091 = vlog2.f32 %v560_v0  ;;  %v500_v7 = vand.u32 2147483647, %v1371_v1  ;;  %v498_v16 = vand.u32 2147483647, %v1375_v8  ;;  %vm831_vm1 = vcmp.lt.s32.totalorder %v1416_v60, 256 }
 0x145   : > { %v510_v3 = vsub.f32 0.0, %v494_v63 }
 0x146   : > { %v516_v14 = vsub.f32 0.0, %v500_v7  ;;  %v514_v25 = vsub.f32 0.0, %v498_v16  ;;  %v740_v7 = vsub.f32 1.0, %v1412_v56  ;;  %v806_v16 = vadd.s32 64, %v1383_v21 }
 0x147   : > { %v1086_v2 = vpop.eup %1085  ;;  %v528_v10 = vmul.f32 1.442695, %v510_v3 }
 0x148   : > { %v431_v5 = vpop.xlane.xlu1 %430  ;;  %v557_v6 = vadd.f32 1.0, %v1086_v2  ;;  %v1088_v9 = vpop.eup %1087  ;;  %v540_v22 = vmul.f32 1.442695, %v516_v14  ;;  %v536_v40 = vmul.f32 1.442695, %v514_v25  ;;  %v1437_v14 = vld [vmem:[%s1286_s14 + $0x30] sm:$0xff] }
 0x149   : > { %v1378_v11 = vadd.f32 %v1348_v37, %v431_v5  ;;  %v1090_v12 = vpop.eup %1089  ;;  %v573_v15 = vmul.f32 0.6931472, %v1088_v9  ;;  %v443_v52 = vpop.xlane.xlu0 %442  ;;  %v481_v5 = vmax.f32 %v1362_v50, 0.0  ;;  %v484_v25 = vmax.f32 %v1371_v1, 0.0 }
 0x14a   : > { %1093 = vlog2.f32 %v557_v6  ;;  %v1092_v17 = vpop.eup %1091  ;;  %v561_v18 = vadd.f32 1.0, %v1090_v12  ;;  %v1424_v2 = vadd.f32 %v1348_v37, %v443_v52  ;;  %v1431_v6 = vadd.s32 %v1388_v31, %v799_v51 }
 0x14b   : > { %1095 = vpow2.f32 %v528_v10  ;;  %v495_v19 = vand.u32 2147483647, %v1378_v11  ;;  %v581_v23 = vmul.f32 0.6931472, %v1092_v17  ;;  %v604_v24 = vadd.f32 %v573_v15, %v476_v20 }
 0x14c   : > { %1097 = vlog2.f32 %v561_v18  ;;  %v482_v52 = vmax.f32 %v1375_v8, 0.0  ;;  %vm832_vm3 = vcmp.lt.s32.totalorder %v1431_v6, 256 }
 0x14d   : > { %v511_v26 = vsub.f32 0.0, %v495_v19  ;;  %1099 = vpow2.f32 %v540_v22  ;;  %v608_v35 = vadd.f32 %v581_v23, %v480_v28  ;;  %v620_v36 = vsub.f32 %v604_v24, %v1351_v41 }
 0x14e   : > { %v803_v41 = vadd.s32 40, %v1383_v21  ;;  %v668_v63 = vsub.f32 0.0, %v604_v24  ;;  %v478_v23 = vmax.f32 %v1367_v58, 0.0  ;;  %v501_v24 = vand.u32 2147483647, %v1424_v2 }
 0x14f   : > { %v530_v32 = vmul.f32 1.442695, %v511_v26  ;;  %v624_v53 = vsub.f32 %v608_v35, %v1354_v42  ;;  %v636_v54 = vsub.f32 0.0, %v620_v36  ;;  %v1421_v42 = vld [vmem:[%s1286_s14 + $0x10] sm:$0xff]  ;;  %v672_v15 = vsub.f32 0.0, %v608_v35  ;;  %v447_v35 = vpop.xlane.xlu2 %446 }
 0x150   : > { %v1094_v27 = vpop.eup %1093  ;;  %v1427_v4 = vadd.s32 %v1388_v31, %v803_v41  ;;  %v734_v17 = vsub.f32 1.0, %v1421_v42  ;;  %v684_v20 = vmax.f32 %v668_v63, -100.0  ;;  %v738_v26 = vsub.f32 1.0, %v1437_v14 }
 0x151   : > { %v1096_v29 = vpop.eup %1095  ;;  %v575_v39 = vmul.f32 0.6931472, %v1094_v27  ;;  %1101 = vpow2.f32 %v530_v32  ;;  %v640_v9 = vsub.f32 0.0, %v624_v53  ;;  %v652_v10 = vmax.f32 %v636_v54, -100.0  ;;  %v439_v54 = vpop.xlane.xlu1 %438 }
 0x152   : > { %v558_v46 = vadd.f32 1.0, %v1096_v29  ;;  %v1098_v47 = vpop.eup %1097  ;;  %1103 = vpow2.f32 %v536_v40  ;;  %v804_v27 = vadd.s32 48, %v1383_v21  ;;  %v688_v36 = vmax.f32 %v672_v15, -100.0 }
 0x153   : > { %v1409_v55 = vadd.f32 %v575_v39, %v477_v45  ;;  %v1100_v57 = vpop.eup %1099  ;;  %v583_v0 = vmul.f32 0.6931472, %v1098_v47  ;;  %v656_v29 = vmax.f32 %v640_v9, -100.0  ;;  %v716_v30 = vmul.f32 %v700_v34, %v652_v10 }
 0x154   : > { %1105 = vlog2.f32 %v558_v46  ;;  %v564_v13 = vadd.f32 1.0, %v1100_v57  ;;  %v1448_v39 = vadd.s32 %v1388_v31, %v806_v16  ;;  %v748_v45 = vmul.f32 %v732_v59, %v684_v20  ;;  %v449_v16 = vpop.xlane.xlu0 %448 }
 0x155   : > { %v621_v12 = vsub.f32 %v1409_v55, %v1359_v49  ;;  %v609_v22 = vadd.f32 %v583_v0, %v481_v5  ;;  %v800_v49 = vadd.s32 16, %v1383_v21  ;;  %v669_v47 = vsub.f32 0.0, %v1409_v55 }
 0x156   : > { %1107 = vlog2.f32 %v564_v13  ;;  %v517_v41 = vsub.f32 0.0, %v501_v24  ;;  %v1458_v53 = vadd.f32 %v1348_v37, %v447_v35  ;;  %v720_v57 = vmul.f32 %v1391_v33, %v656_v29 }
 0x157   : > { %v1102_v3 = vpop.eup %1101  ;;  %v637_v32 = vsub.f32 0.0, %v621_v12  ;;  %v625_v46 = vsub.f32 %v609_v22, %v1362_v50  ;;  %v1454_v34 = vadd.s32 %v1388_v31, %v800_v49  ;;  %v764_v63 = vadd.f32 %v748_v45, %v716_v30  ;;  %v1465_v50 = vld [vmem:[%s1286_s14 + $0x18] sm:$0xff] }
 0x158   : > { %v559_v18 = vadd.f32 1.0, %v1102_v3  ;;  %v1104_v19 = vpop.eup %1103  ;;  %v1462_v59 = vadd.s32 %v1388_v31, %v804_v27  ;;  %v673_v55 = vsub.f32 0.0, %v609_v22  ;;  %v542_v3 = vmul.f32 1.442695, %v517_v41 }
 0x159   : > { %v562_v40 = vadd.f32 1.0, %v1104_v19  ;;  %v653_v0 = vmax.f32 %v637_v32, -100.0  ;;  %v503_v5 = vand.u32 2147483647, %v1458_v53  ;;  %v752_v10 = vmul.f32 %v736_v38, %v688_v36 }
 0x15a   : > { %v1106_v28 = vpop.eup %1105  ;;  %1109 = vlog2.f32 %v559_v18  ;;  %v641_v12 = vsub.f32 0.0, %v625_v46  ;;  %v685_v13 = vmax.f32 %v669_v47, -100.0  ;;  %v1471_v15 = vadd.f32 %v1348_v37, %v439_v54 }
 0x15b   : > { %v577_v51 = vmul.f32 0.6931472, %v1106_v28  ;;  %1111 = vlog2.f32 %v562_v40  ;;  %v735_v20 = vsub.f32 1.0, %v1465_v50  ;;  %v801_v22 = vadd.s32 24, %v1383_v21 }
 0x15c   : > { %v1108_v9 = vpop.eup %1107  ;;  %v519_v24 = vsub.f32 0.0, %v503_v5  ;;  %v768_v49 = vadd.f32 %v752_v10, %v720_v57  ;;  %v717_v27 = vmul.f32 %v1399_v44, %v653_v0  ;;  %v479_v33 = vmax.f32 %v1378_v11, 0.0  ;;  %v453_v57 = vpop.xlane.xlu2 %452 }
 0x15d   : > { %v1473_v19 = vadd.f32 %v577_v51, %v478_v23  ;;  %v780_v28 = vsub.f32 0.0, %v764_v63  ;;  %v689_v29 = vmax.f32 %v673_v55, -100.0  ;;  %v589_v30 = vmul.f32 0.6931472, %v1108_v9 }
 0x15e   : > { %1113 = vpow2.f32 %v542_v3  ;;  %v657_v32 = vmax.f32 %v641_v12, -100.0  ;;  %v749_v23 = vmul.f32 %v733_v62, %v685_v13  ;;  %v499_v36 = vand.u32 2147483647, %v1471_v15  ;;  %v445_v3 = vpop.xlane.xlu1 %444 }
 0x15f   : > { %v622_v45 = vsub.f32 %v1473_v19, %v1367_v58  ;;  %v1486_v46 = vadd.s32 %v1388_v31, %v801_v22  ;;  %v546_v47 = vmul.f32 1.442695, %v519_v24  ;;  %v1489_v41 = vadd.f32 %v1348_v37, %v449_v16 }
 0x160   : > { %v1110_v18 = vpop.eup %1109  ;;  %v784_v51 = vsub.f32 0.0, %v768_v49  ;;  %v765_v54 = vadd.f32 %v749_v23, %v717_v27  ;;  %v1494_v62 = vadd.s32 72, %v1383_v21  ;;  %v1498_v58 = vsel %vm831_vm1, %v780_v28, 0.0 }
 0x161   : > { %v579_v38 = vmul.f32 0.6931472, %v1110_v18  ;;  %v1112_v40 = vpop.eup %1111  ;;  %v753_v63 = vmul.f32 %v737_v61, %v689_v29  ;;  %v612_v0 = vadd.f32 %v589_v30, %v484_v25  ;;  %v515_v55 = vsub.f32 0.0, %v499_v36 }
 0x162   : > { %v721_v5 = vmul.f32 %v1396_v43, %v657_v32  ;;  %v585_v9 = vmul.f32 0.6931472, %v1112_v40  ;;  %v504_v10 = vand.u32 2147483647, %v1489_v41  ;;  %v638_v13 = vsub.f32 0.0, %v622_v45  ;;  %v455_v43 = vpop.xlane.xlu0 %454 }
 0x163   : > { %v607_v35 = vadd.f32 %v579_v38, %v479_v33  ;;  %1115 = vpow2.f32 %v546_v47  ;;  %v538_v60 = vmul.f32 1.442695, %v515_v55  ;;  %v1508_v16 = vadd.f32 %v1348_v37, %v453_v57 }
 0x164   : > { %v1114_v12 = vpop.eup %1113  ;;  %v781_v61 = vsub.f32 0.0, %v765_v54  ;;  %v520_v25 = vsub.f32 0.0, %v504_v10  ;;  %v1511_v22 = vadd.f32 %v1348_v37, %v445_v3  ;;  %v676_v24 = vsub.f32 0.0, %v612_v0 }
 0x165   : > { %v623_v44 = vsub.f32 %v607_v35, %v1378_v11  ;;  %v670_v11 = vsub.f32 0.0, %v1473_v19  ;;  %v628_v19 = vsub.f32 %v612_v0, %v1371_v1  ;;  %1117 = vpow2.f32 %v538_v60 }
 0x166   : > { %v506_v49 = vand.u32 2147483647, %v1508_v16  ;;  %v1517_v27 = vadd.f32 %v585_v9, %v482_v52  ;;  %v671_v33 = vsub.f32 0.0, %v607_v35  ;;  %v565_v38 = vadd.f32 1.0, %v1114_v12 }
 0x167   : > { %v639_v18 = vsub.f32 0.0, %v623_v44  ;;  %v548_v28 = vmul.f32 1.442695, %v520_v25  ;;  %vm836_vm5 = vcmp.lt.s32.totalorder %v1427_v4, 256  ;;  %v654_v29 = vmax.f32 %v638_v13, -100.0 }
 0x168   : > { %v522_v30 = vsub.f32 0.0, %v506_v49  ;;  %v502_v32 = vand.u32 2147483647, %v1511_v22  ;;  %v1522_v23 = vadd.f32 %v1348_v37, %v455_v43  ;;  %v851_v1 = vsel %vm835_vm2, %v784_v51, 0.0 }
 0x169   : > { %v769_v36 = vadd.f32 %v753_v63, %v721_v5  ;;  %v686_v40 = vmax.f32 %v670_v11, -100.0  ;;  %v655_v45 = vmax.f32 %v639_v18, -100.0  ;;  %v1116_v52 = vpop.eup %1115  ;;  %v644_v35 = vsub.f32 0.0, %v628_v19  ;;  %v1535_v11 = vld [vmem:[%s1286_s14 + $0x48] sm:$0xff] }
 0x16a   : > { %1119 = vpow2.f32 %v548_v28  ;;  %v552_v47 = vmul.f32 1.442695, %v522_v30  ;;  %v518_v54 = vsub.f32 0.0, %v502_v32  ;;  %v626_v44 = vsub.f32 %v1517_v27, %v1375_v8 }
 0x16b   : > { %v687_v57 = vmax.f32 %v671_v33, -100.0  ;;  %1121 = vlog2.f32 %v565_v38  ;;  %v507_v0 = vand.u32 2147483647, %v1522_v23  ;;  %v1118_v55 = vpop.eup %1117  ;;  %v848_v48 = vsel %vm832_vm3, %v781_v61, 0.0 }
 0x16c   : > { %v692_v51 = vmax.f32 %v676_v24, -100.0  ;;  %v718_v63 = vmul.f32 %v1421_v42, %v654_v29  ;;  %v544_v3 = vmul.f32 1.442695, %v518_v54  ;;  %vm833_vm6 = vcmp.lt.s32.totalorder %v1454_v34, 256 }
 0x16d   : > { %v719_v5 = vmul.f32 %v1465_v50, %v655_v45  ;;  %v567_v9 = vadd.f32 1.0, %v1116_v52  ;;  %v563_v8 = vadd.f32 1.0, %v1118_v55  ;;  %1123 = vpow2.f32 %v552_v47  ;;  %v1561_v47 = vld [vmem:[%s1286_s14 + $0x58] sm:$0xff] }
 0x16e   : > { %v785_v10 = vsub.f32 0.0, %v769_v36  ;;  %v750_v12 = vmul.f32 %v734_v17, %v686_v40  ;;  %vm834_vm7 = vcmp.lt.s32.totalorder %v1486_v46, 256  ;;  %1125 = vpow2.f32 %v544_v3 }
 0x16f   : > { %v523_v6 = vsub.f32 0.0, %v507_v0  ;;  %v660_v13 = vmax.f32 %v644_v35, -100.0  ;;  %v642_v60 = vsub.f32 0.0, %v626_v44  ;;  %v751_v61 = vmul.f32 %v735_v20, %v687_v57 }
 0x170   : > { %1127 = vlog2.f32 %v563_v8  ;;  %v1120_v18 = vpop.eup %1119  ;;  %v865_v25 = vsel %vm864_vm4, %v1498_v58, 0.0  ;;  %v766_v43 = vadd.f32 %v750_v12, %v718_v63  ;;  %v674_v19 = vsub.f32 0.0, %v1517_v27  ;;  %v451_v27 = vpop.xlane.xlu1 %450 }
 0x171   : > { %v741_v42 = vsub.f32 1.0, %v1535_v11  ;;  %v1122_v17 = vpop.eup %1121  ;;  %v1547_v24 = vsel %vm864_vm4, %v851_v1, 0.0  ;;  %v767_v49 = vadd.f32 %v751_v61, %v719_v5  ;;  %1129 = vlog2.f32 %v567_v9 }
 0x172   : > { %v568_v33 = vadd.f32 1.0, %v1120_v18  ;;  %v866_v50 = vsel %vm864_vm4, %v848_v48, 0.0  ;;  %v1552_v20 = vadd.s32 %v1388_v31, %v1494_v62  ;;  %v485_v58 = vmax.f32 %v1424_v2, 0.0 }
 0x173   : > { %v554_v38 = vmul.f32 1.442695, %v523_v6  ;;  %v1124_v28 = vpop.eup %1123  ;;  %v852_v29 = vsel %vm836_vm5, %v785_v10, 0.0  ;;  %v724_v30 = vmul.f32 %v1412_v56, %v660_v13  ;;  %v756_v32 = vmul.f32 %v740_v7, %v692_v51  ;;  %v707_v56 = vld [vmem:[%s1286_s14 + $0x38] sm:$0xff] }
 0x174   : > { %v658_v1 = vmax.f32 %v642_v60, -100.0  ;;  %v1126_v36 = vpop.eup %1125  ;;  %v782_v40 = vsub.f32 0.0, %v766_v43  ;;  %v690_v62 = vmax.f32 %v674_v19, -100.0  ;;  %v591_v45 = vmul.f32 0.6931472, %v1122_v17 }
 0x175   : > { %1131 = vlog2.f32 %v568_v33  ;;  %v783_v35 = vsub.f32 0.0, %v767_v49  ;;  %v566_v54 = vadd.f32 1.0, %v1126_v36  ;;  %v1564_v4 = vadd.f32 %v1348_v37, %v451_v27 }
 0x176   : > { %v1128_v52 = vpop.eup %1127  ;;  %1133 = vpow2.f32 %v554_v38  ;;  %v867_v44 = vadd.f32 %v866_v50, %v865_v25  ;;  %vm839_vm8 = vcmp.lt.s32.totalorder %v1448_v39, 256  ;;  %v483_v7 = vmax.f32 %v1471_v15, 0.0 }
 0x177   : > { %v587_v57 = vmul.f32 0.6931472, %v1128_v52  ;;  %v570_v0 = vadd.f32 1.0, %v1124_v28  ;;  %v1130_v55 = vpop.eup %1129  ;;  %v1570_v48 = vsel %vm864_vm4, %v852_v29, 0.0  ;;  %v772_v51 = vadd.f32 %v756_v32, %v724_v30 }
 0x178   : > { %v722_v63 = vmul.f32 %v1437_v14, %v658_v1  ;;  %1135 = vlog2.f32 %v566_v54  ;;  %v849_v37 = vsel %vm833_vm6, %v782_v40, 0.0  ;;  %v613_v3 = vadd.f32 %v591_v45, %v485_v58 }
 0x179   : > { %v743_v5 = vsub.f32 1.0, %v1561_v47  ;;  %v611_v9 = vadd.f32 %v587_v57, %v483_v7  ;;  %v754_v8 = vmul.f32 %v738_v26, %v690_v62  ;;  %v850_v10 = vsel %vm834_vm7, %v783_v35, 0.0 }
 0x17a   : > { %v739_v12 = vsub.f32 1.0, %v707_v56  ;;  %v505_v6 = vand.u32 2147483647, %v1564_v4  ;;  %v595_v60 = vmul.f32 0.6931472, %v1130_v55  ;;  %1137 = vlog2.f32 %v570_v0 }
 0x17b   : > { %v1132_v13 = vpop.eup %1131  ;;  %v627_v61 = vsub.f32 %v611_v9, %v1471_v15  ;;  %v675_v18 = vsub.f32 0.0, %v611_v9  ;;  %v788_v25 = vsub.f32 0.0, %v772_v51  ;;  %v868_v43 = vsel %vm864_vm4, %v849_v37, 0.0  ;;  %v710_v51 = vld [vmem:[%s1286_s14 + $0x50] sm:$0xff] }
 0x17c   : > { %v1134_v34 = vpop.eup %1133  ;;  %v770_v19 = vadd.f32 %v754_v8, %v722_v63  ;;  %v487_v14 = vmax.f32 %v1458_v53, 0.0  ;;  %v629_v26 = vsub.f32 %v613_v3, %v1424_v2  ;;  %v809_v46 = vadd.s32 88, %v1383_v21 }
 0x17d   : > { %v643_v17 = vsub.f32 0.0, %v627_v61  ;;  %v521_v49 = vsub.f32 0.0, %v505_v6  ;;  %vm837_vm9 = vcmp.lt.s32.totalorder %v1462_v59, 256  ;;  %v870_v15 = vsel %vm864_vm4, %v850_v10, 0.0 }
 0x17e   : > { %v1136_v33 = vpop.eup %1135  ;;  %v691_v50 = vmax.f32 %v675_v18, -100.0  ;;  %v486_v58 = vmax.f32 %v1511_v22, 0.0  ;;  %v571_v38 = vadd.f32 1.0, %v1134_v34  ;;  %v615_v27 = vadd.f32 %v595_v60, %v487_v14 }
 0x17f   : > { %v659_v28 = vmax.f32 %v643_v17, -100.0  ;;  %v597_v29 = vmul.f32 0.6931472, %v1132_v13  ;;  %v593_v30 = vmul.f32 0.6931472, %v1136_v33  ;;  %v869_v32 = vadd.f32 %v868_v43, %v867_v44 }
 0x180   : > { %v805_v2 = vadd.s32 56, %v1383_v21  ;;  %v488_v1 = vmax.f32 %v1489_v41, 0.0  ;;  %1139 = vlog2.f32 %v571_v38  ;;  %v1138_v36 = vpop.eup %1137  ;;  %v645_v40 = vsub.f32 0.0, %v629_v26 }
 0x181   : > { %v723_v62 = vmul.f32 %v707_v56, %v659_v28  ;;  %v614_v45 = vadd.f32 %v593_v30, %v486_v58  ;;  %v550_v52 = vmul.f32 1.442695, %v521_v49  ;;  %v855_v35 = vsel %vm839_vm8, %v788_v25, 0.0 }
 0x182   : > { %v786_v54 = vsub.f32 0.0, %v770_v19  ;;  %v871_v7 = vadd.f32 %v870_v15, %v869_v32  ;;  %v755_v57 = vmul.f32 %v739_v12, %v691_v50  ;;  %v677_v0 = vsub.f32 0.0, %v613_v3 }
 0x183   : > { %v631_v44 = vsub.f32 %v615_v27, %v1458_v53  ;;  %v616_v55 = vadd.f32 %v597_v29, %v488_v1  ;;  %v630_v63 = vsub.f32 %v614_v45, %v1511_v22  ;;  %v601_v9 = vmul.f32 0.6931472, %v1138_v36 }
 0x184   : > { %v771_v37 = vadd.f32 %v755_v57, %v723_v62  ;;  %v678_v8 = vsub.f32 0.0, %v614_v45  ;;  %1141 = vpow2.f32 %v550_v52  ;;  %v661_v56 = vmax.f32 %v645_v40, -100.0  ;;  %v714_v57 = vld [vmem:[%s1286_s14 + $0x70] sm:$0xff] }
 0x185   : > { %v1597_v10 = vadd.s32 %v1388_v31, %v809_v46  ;;  %v822_v39 = vadd.s32 %v1388_v31, %v805_v2  ;;  %v646_v6 = vsub.f32 0.0, %v630_v63  ;;  %v873_v3 = vadd.f32 %v1547_v24, %v871_v7 }
 0x186   : > { %v1140_v13 = vpop.eup %1139  ;;  %v490_v53 = vmax.f32 %v1508_v16, 0.0  ;;  %v742_v12 = vsub.f32 1.0, %v710_v51  ;;  %v491_v60 = vmax.f32 %v1522_v23, 0.0  ;;  %v693_v22 = vmax.f32 %v677_v0, -100.0 }
 0x187   : > { %v647_v61 = vsub.f32 0.0, %v631_v44  ;;  %v632_v18 = vsub.f32 %v616_v55, %v1489_v41  ;;  %v662_v34 = vmax.f32 %v646_v6, -100.0  ;;  %v787_v25 = vsub.f32 0.0, %v771_v37 }
 0x188   : > { %v618_v43 = vadd.f32 %v601_v9, %v490_v53  ;;  %v694_v19 = vmax.f32 %v678_v8, -100.0  ;;  %v603_v14 = vmul.f32 0.6931472, %v1140_v13  ;;  %v853_v26 = vsel %vm837_vm9, %v786_v54, 0.0  ;;  %v715_v8 = vld [vmem:[%s1286_s14 + $0x78] sm:$0xff] }
 0x189   : > { %v725_v46 = vmul.f32 %v1535_v11, %v661_v56  ;;  %v679_v24 = vsub.f32 0.0, %v615_v27  ;;  %vm838_vm10 = vcmp.lt.s32.totalorder %v822_v39, 256  ;;  %vm840_vm11 = vcmp.lt.s32.totalorder %v1552_v20, 256 }
 0x18a   : > { %v1142_v17 = vpop.eup %1141  ;;  %v875_v49 = vadd.f32 %v1570_v48, %v873_v3  ;;  %v808_v41 = vadd.s32 80, %v1383_v21  ;;  %v726_v33 = vmul.f32 %v710_v51, %v662_v34  ;;  %v619_v15 = vadd.f32 %v603_v14, %v491_v60  ;;  %v712_v48 = vld [vmem:[%s1286_s14 + $0x60] sm:$0xff] }
 0x18b   : > { %v757_v50 = vmul.f32 %v741_v42, %v693_v22  ;;  %v663_v58 = vmax.f32 %v647_v61, -100.0  ;;  %v648_v59 = vsub.f32 0.0, %v632_v18  ;;  %v569_v38 = vadd.f32 1.0, %v1142_v17 }
 0x18c   : > { %v876_v28 = vsel %vm864_vm4, %v853_v26, 0.0  ;;  %v854_v27 = vsel %vm838_vm10, %v787_v25, 0.0  ;;  %v634_v29 = vsub.f32 %v618_v43, %v1508_v16  ;;  %v758_v30 = vmul.f32 %v742_v12, %v694_v19  ;;  %v713_v12 = vld [vmem:[%s1286_s14 + $0x68] sm:$0xff] }
 0x18d   : > { %v773_v32 = vadd.f32 %v757_v50, %v725_v46  ;;  %v695_v2 = vmax.f32 %v679_v24, -100.0  ;;  %v680_v1 = vsub.f32 0.0, %v616_v55  ;;  %1143 = vlog2.f32 %v569_v38 }
 0x18e   : > { %v877_v36 = vadd.f32 %v876_v28, %v875_v49  ;;  %v810_v40 = vadd.s32 96, %v1383_v21  ;;  %v774_v11 = vadd.f32 %v758_v30, %v726_v33  ;;  %v635_v42 = vsub.f32 %v619_v15, %v1522_v23 }
 0x18f   : > { %v727_v62 = vmul.f32 %v1561_v47, %v663_v58  ;;  %v878_v45 = vsel %vm864_vm4, %v854_v27, 0.0  ;;  %v664_v52 = vmax.f32 %v648_v59, -100.0  ;;  %v825_v16 = vadd.s32 %v1388_v31, %v808_v41 }
 0x190   : > { %v880_v54 = vsel %vm864_vm4, %v855_v35, 0.0  ;;  %vm842_vm12 = vcmp.lt.s32.totalorder %v1597_v10, 256  ;;  %v744_v7 = vsub.f32 1.0, %v712_v48  ;;  %v650_v0 = vsub.f32 0.0, %v634_v29 }
 0x191   : > { %v789_v44 = vsub.f32 0.0, %v773_v32  ;;  %v759_v23 = vmul.f32 %v743_v5, %v695_v2  ;;  %v696_v55 = vmax.f32 %v680_v1, -100.0  ;;  %v682_v51 = vsub.f32 0.0, %v618_v43 }
 0x192   : > { %v879_v63 = vadd.f32 %v878_v45, %v877_v36  ;;  %v827_v37 = vadd.s32 %v1388_v31, %v810_v40  ;;  %v790_v9 = vsub.f32 0.0, %v774_v11  ;;  %v651_v56 = vsub.f32 0.0, %v635_v42 }
 0x193   : > { %v1144_v39 = vpop.eup %1143  ;;  %v775_v35 = vadd.f32 %v759_v23, %v727_v62  ;;  %v728_v6 = vmul.f32 %v712_v48, %v664_v52  ;;  %v746_v13 = vsub.f32 1.0, %v714_v57  ;;  %vm841_vm13 = vcmp.lt.s32.totalorder %v825_v16, 256 }
 0x194   : > { %v666_v3 = vmax.f32 %v650_v0, -100.0  ;;  %v683_v53 = vsub.f32 0.0, %v619_v15  ;;  %v489_v47 = vmax.f32 %v1564_v4, 0.0  ;;  %v599_v60 = vmul.f32 0.6931472, %v1144_v39 }
 0x195   : > { %v856_v5 = vsel %vm840_vm11, %v789_v44, 0.0  ;;  %v760_v22 = vmul.f32 %v744_v7, %v696_v55  ;;  %v698_v61 = vmax.f32 %v682_v51, -100.0  ;;  %v747_v18 = vsub.f32 1.0, %v715_v8 }
 0x196   : > { %v881_v34 = vadd.f32 %v880_v54, %v879_v63  ;;  %v857_v25 = vsel %vm841_vm13, %v790_v9, 0.0  ;;  %v667_v43 = vmax.f32 %v651_v56, -100.0  ;;  %v617_v19 = vadd.f32 %v599_v60, %v489_v47 }
 0x197   : > { %v791_v14 = vsub.f32 0.0, %v775_v35  ;;  %v776_v26 = vadd.f32 %v760_v22, %v728_v6  ;;  %v812_v46 = vadd.s32 112, %v1383_v21  ;;  %v745_v24 = vsub.f32 1.0, %v713_v12 }
 0x198   : > { %v730_v17 = vmul.f32 %v714_v57, %v666_v3  ;;  %v699_v49 = vmax.f32 %v683_v53, -100.0  ;;  %v633_v41 = vsub.f32 %v617_v19, %v1564_v4  ;;  %v681_v33 = vsub.f32 0.0, %v617_v19  ;;  %v863_v53 = vld [vmem:[#allocation2] sm:$0x1] }
 0x199   : > { %v882_v20 = vsel %vm864_vm4, %v856_v5, 0.0  ;;  %v762_v15 = vmul.f32 %v746_v13, %v698_v61  ;;  %v884_v50 = vsel %vm864_vm4, %v857_v25, 0.0  ;;  %v811_v58 = vadd.s32 104, %v1383_v21 }
 0x19a   : > { %v883_v59 = vadd.f32 %v882_v20, %v881_v34  ;;  %v731_v38 = vmul.f32 %v715_v8, %v667_v43  ;;  %v649_v28 = vsub.f32 0.0, %v633_v41  ;;  %v697_v27 = vmax.f32 %v681_v33, -100.0 }
 0x19b   : > { %v858_v29 = vsel %vm842_vm12, %v791_v14, 0.0  ;;  %v792_v30 = vsub.f32 0.0, %v776_v26  ;;  %v813_v32 = vadd.s32 120, %v1383_v21  ;;  %v778_v2 = vadd.f32 %v762_v15, %v730_v17 }
 0x19c   : > { %v885_v4 = vadd.f32 %v884_v50, %v883_v59  ;;  %v763_v48 = vmul.f32 %v747_v18, %v699_v49  ;;  %v665_v1 = vmax.f32 %v649_v28, -100.0  ;;  %vm843_vm14 = vcmp.lt.s32.totalorder %v827_v37, 256 }
 0x19d   : > { %v829_v36 = vadd.s32 %v1388_v31, %v812_v46  ;;  %v828_v40 = vadd.s32 %v1388_v31, %v811_v58  ;;  %v761_v62 = vmul.f32 %v745_v24, %v697_v27  ;;  %v886_v45 = vsel %vm864_vm4, %v858_v29, 0.0 }
 0x19e   : > { %v779_v11 = vadd.f32 %v763_v48, %v731_v38  ;;  %v729_v42 = vmul.f32 %v713_v12, %v665_v1  ;;  %v830_v10 = vadd.s32 %v1388_v31, %v813_v32  ;;  %v859_v52 = vsel %vm843_vm14, %v792_v30, 0.0 }
 0x19f   : > { %v794_v16 = vsub.f32 0.0, %v778_v2  ;;  %v887_v54 = vadd.f32 %v886_v45, %v885_v4  ;;  %vm845_vm15 = vcmp.lt.s32.totalorder %v829_v36, 256  ;;  %vm844_vm0 = vcmp.lt.s32.totalorder %v828_v40, 256 }
 0x1a0   : > { %v777_v21 = vadd.f32 %v761_v62, %v729_v42  ;;  %v795_v7 = vsub.f32 0.0, %v779_v11  ;;  %v888_v0 = vsel %vm864_vm4, %v859_v52, 0.0  ;;  %vm846_vm1 = vcmp.lt.s32.totalorder %v830_v10, 256 }
 0x1a1   : > { %v861_v44 = vsel %vm845_vm15, %v794_v16, 0.0  ;;  %v889_v55 = vadd.f32 %v888_v0, %v887_v54  ;;  %vm903_vm2 = vcmask 0  }
 0x1a2   : > { %v793_v57 = vsub.f32 0.0, %v777_v21  ;;  %v862_v63 = vsel %vm846_vm1, %v795_v7, 0.0  ;;  %v892_v31 = vsel %vm864_vm4, %v861_v44, 0.0 }
 0x1a3   : > { %v894_v8 = vsel %vm864_vm4, %v862_v63, 0.0 }
 0x1a4   : > { %v860_v23 = vsel %vm844_vm0, %v793_v57, 0.0 }
 0x1a5   : > { %v890_v51 = vsel %vm864_vm4, %v860_v23, 0.0 }
 0x1a6   : > { %v891_v37 = vadd.f32 %v890_v51, %v889_v55 }
 0x1a8   : > { %v893_v9 = vadd.f32 %v892_v31, %v891_v37 }
 0x1aa   : > { %v895_v56 = vadd.f32 %v894_v8, %v893_v9 }
 0x1ac   : > { %v896_v39 = vrot.slane %v895_v56, 4 }
 0x1ae   : > { %v897_v35 = vadd.f32 %v896_v39, %v895_v56 }
 0x1b0   : > { %v898_v6 = vrot.slane %v897_v35, 2 }
 0x1b2   : > { %v899_v13 = vadd.f32 %v898_v6, %v897_v35 }
 0x1b4   : > { %v900_v3 = vrot.slane %v899_v13, 1 }
 0x1b6   : > { %v901_v12 = vadd.f32 %v900_v3, %v899_v13  ;;  %908 = sbr.rel (%p996_p8) target bundleno = 453 (0x1c5), region = 56 }
 0x1b8   : > { %v902_v47 = vadd.f32 %v901_v12, %v863_v53 }
 0x1ba   : > { %904 = vst.msk [vmem:[#allocation2] sm:$0x1] %vm903_vm2, %v902_v47 }
 0x1c1   : > { %v909_v60 = vld [vmem:[#allocation2] sm:$0x1] }
 0x1c2   : > { %v910_v5 = vmul.f32 0.00390625, %v909_v60 }
 0x1c4   : > { %911 = vst.msk [vmem:[#allocation7] sm:$0x1] %vm903_vm2, %v910_v5 }
 0x1c5 PF: > { %p1063_p9 = scmp.eq.s32.totalorder %s1271_s27, 1  ;;  %s1223_s20 = smov [#allocation7]  }
 0x1c6   : > { %s918_s21 = sshll.u32 %s1223_s20, 4  ;;  %s920_s25 = sshll.u32 %s1661_s6, 4  ;;  %s919_s21 = int_to_ptr.vmem [resolvable:$true] %s918_s21  ;;  %s921_s25 = int_to_ptr.hbm [resolvable:$true] %s920_s25 }
 0x1c7   : > { %1054 = dma.vmem_to_hbm [thread:$0]  (%p1063_p9), %s919_s21, 16, %s921_s25, [#allocation6]  }
 0x1c8   : > { %1212 = dma.done.wait (%p1063_p9), [#allocation6], 16  }
 0x1c9   : > { %1214 = vsyncadd (%p1063_p9), [#allocation6], 4294967280 }
 0x1ca PF: > { %s20_s23 = sadd.s32 1, %s1217_s23  }
 0x1cb   : > { %p17_p10 = scmp.ge.s32.totalorder %s20_s23, 4  }
 0x1cd   :  { %19 = sbr.rel (!%p17_p10) target bundleno = 5 (0x5), region = 87 }
 0x1d2   :  { %934 = vsyncpa [#allocation5], 1 }
 0x1d3   :  { %936 = vsyncpa [#allocation5 + $0x1], 1 }
 0x1d4   :  { %937 = vsyncpa [#allocation6], 1 }
 0x1d5   :  { %939 = vsyncpa [#allocation6 + $0x1], 1 }

</bundles_post_ra>
